<compile_context>
chip_gen: v6e
topology: v6e:2x2x1
jax: 0.10.0
libtpu: 0.0.40
codegen_flags: <defaults>
</compile_context>

<pallas_src>
import jax
import jax.numpy as jnp
from jax import lax
from jax.experimental import pallas as pl
from jax.experimental.pallas import tpu as pltpu


def _mlp_kernel(x_ref, w0_ref, b0_ref, w1_ref, b1_ref, w2_ref, b2_ref, o_ref):
    """Fused 3-layer MLP on a batch tile; x arrives in native [TB, 30] layout."""
    # dense0: contract x's last (feature) dim -> batch lands on the lane axis.
    h0 = lax.dot_general(
        w0_ref[...], x_ref[...],
        dimension_numbers=(((1,), (1,)), ((), ())),
        preferred_element_type=jnp.float32)                  # [16, TB] f32
    h0 = jnp.maximum(h0 + b0_ref[...], 0.0)                  # bias + ReLU (dropout0 = id)

    # dense1
    h1 = jnp.dot(w1_ref[...], h0, preferred_element_type=jnp.float32)   # [16, TB]
    h1 = jnp.maximum(h1 + b1_ref[...], 0.0)                  # bias + ReLU (dropout1 = id)

    # dense2 + sigmoid (stable tanh form; tanh goes to the EUP, no VALU divide)
    z = jnp.dot(w2_ref[...], h1, preferred_element_type=jnp.float32)    # [1, TB]
    z = z + b2_ref[...]
    o_ref[...] = (0.5 * (jnp.tanh(0.5 * z) + 1.0)).astype(o_ref.dtype)  # lane-dense [1, TB]


def classificador_forward(x, params, *, batch_tile=16384, training=False):
    """x: [B, 30] float32 -> [B, 1] float32.

    params are in PyTorch layout: W [out, in], b stored as [out, 1].
    """
    if training:
        # TODO(synk): training-mode dropout not implemented; eval mode only.
        raise NotImplementedError("Classificador Pallas kernel supports eval mode only")

    w0, b0, w1, b1, w2, b2 = params
    B, F = x.shape
    assert F == 30

    # Lane tile: multiple of 128, no larger than needed. Cap at 16K lanes: the
    # native-layout [tile, 30] f32 input block lane-pads 30->128 in VMEM, so a
    # 16K tile already costs ~8 MiB per buffer (x2 double-buffered) while
    # moving ~2 MB of HBM per step (well past the ~0.35 us step overhead).
    max_tile = max(128, (min(batch_tile, 16384) // 128) * 128)
    tile = min(max_tile, pl.cdiv(B, 128) * 128)
    # v7x megacore: keep >= 2 grid steps whenever the batch allows it so the
    # "parallel" batch axis shards across both TensorCores.
    if B > 256:
        tile = min(tile, pl.cdiv(pl.cdiv(B, 2), 128) * 128)
    tile = max(tile, 128)
    grid = (pl.cdiv(B, tile),)          # trailing block overhangs; OOB writes dropped

    w0, w1, w2 = (w.astype(jnp.float32) for w in (w0, w1, w2))
    b0, b1, b2 = (b.astype(jnp.float32) for b in (b0, b1, b2))
    x = x.astype(jnp.float32)

    in_specs = [
        pl.BlockSpec((tile, F), lambda i: (i, 0)),        # x tile, native [TB, 30]
        pl.BlockSpec(w0.shape, lambda i: (0, 0)),         # W0 [16, 30]
        pl.BlockSpec(b0.shape, lambda i: (0, 0)),         # b0 [16, 1]
        pl.BlockSpec(w1.shape, lambda i: (0, 0)),         # W1 [16, 16]
        pl.BlockSpec(b1.shape, lambda i: (0, 0)),         # b1 [16, 1]
        pl.BlockSpec(w2.shape, lambda i: (0, 0)),         # W2 [1, 16]
        pl.BlockSpec(b2.shape, lambda i: (0, 0)),         # b2 [1, 1]
    ]
    out_specs = pl.BlockSpec((1, tile), lambda i: (0, i))  # lane-dense [1, TB]

    outT = pl.pallas_call(
        _mlp_kernel,
        out_shape=jax.ShapeDtypeStruct((1, B), jnp.float32),
        grid_spec=pltpu.PrefetchScalarGridSpec(
            num_scalar_prefetch=0,
            grid=grid,
            in_specs=in_specs,
            out_specs=out_specs,
        ),
        compiler_params=pltpu.CompilerParams(
            dimension_semantics=("parallel",),     # shard batch tiles across v7x cores
            # Double-buffered, lane-padded [16K, 30]->[16K, 128] f32 input block
            # (~16 MiB) plus [*, TB] f32 temporaries exceeds v5e's 16 MiB default
            # scoped-VMEM limit; 48 MiB is safely below physical VMEM everywhere
            # (128 MiB v5e/v6e, 64 MiB per-TC v7x).
            vmem_limit_bytes=48 * 1024 * 1024,
        ),
    )(x, w0, b0, w1, b1, w2, b2)

    # (1, B) -> (B, 1) is a free, layout-compatible reshape (no padded lanes to slice).
    return outT.reshape(B, 1)


def init_params(key):
    """Deterministic init mirroring the PyTorch __init__:
    weights ~ U(0,1) (torch.nn.init.uniform), biases use nn.Linear's default
    U(-1/sqrt(fan_in), 1/sqrt(fan_in)). Weights kept in PyTorch [out, in]
    layout; biases stored as [out, 1] column vectors."""
    k = jax.random.split(key, 6)

    def bias(kk, fan_in, fan_out):
        bound = 1.0 / jnp.sqrt(float(fan_in))
        return jax.random.uniform(kk, (fan_out, 1), jnp.float32, -bound, bound)

    w0 = jax.random.uniform(k[0], (16, 30), jnp.float32)   # dense0.weight
    b0 = bias(k[1], 30, 16)
    w1 = jax.random.uniform(k[2], (16, 16), jnp.float32)   # dense1.weight
    b1 = bias(k[3], 16, 16)
    w2 = jax.random.uniform(k[4], (1, 16), jnp.float32)    # dense2.weight
    b2 = bias(k[5], 16, 1)
    return (w0, b0, w1, b1, w2, b2)


def reference_forward(x, params):
    """Pure-JAX f32 reference (eval mode) for correctness checking."""
    w0, b0, w1, b1, w2, b2 = params
    h0 = jnp.maximum(x @ w0.T + b0.T, 0.0)
    h1 = jnp.maximum(h0 @ w1.T + b1.T, 0.0)
    return jax.nn.sigmoid(h1 @ w2.T + b2.T)


if __name__ == "__main__":
    key = jax.random.PRNGKey(0)
    pkey, xkey = jax.random.split(key)
    params = init_params(pkey)

    # Small batch: single 128-lane tile with an overhanging block (B=8 < 128).
    x_small = jax.random.normal(xkey, (8, 30), jnp.float32)
    out_small = jax.block_until_ready(classificador_forward(x_small, params))
    ref_small = reference_forward(x_small, params)
    assert out_small.shape == (8, 1), out_small.shape
    assert jnp.allclose(out_small, ref_small, atol=1e-2, rtol=0), (out_small, ref_small)

    # Slightly larger batch: exercises the 2-step grid (v7x megacore sharding)
    # and the overhanging trailing block path.
    x_big = jax.random.normal(jax.random.fold_in(xkey, 1), (300, 30), jnp.float32)
    out_big = jax.block_until_ready(classificador_forward(x_big, params))
    ref_big = reference_forward(x_big, params)
    assert out_big.shape == (300, 1), out_big.shape
    assert jnp.allclose(out_big, ref_big, atol=1e-2, rtol=0), (out_big, ref_big)

    print("KERNEL_OK")
</pallas_src>

<mosaic_0001>
module attributes {stable_mosaic.version = 11 : i64} {
  func.func @_mlp_kernel(%arg0: i32, %arg1: memref<128x30xf32, #tpu.memory_space<vmem>>, %arg2: memref<16x30xf32, #tpu.memory_space<vmem>>, %arg3: memref<16x1xf32, #tpu.memory_space<vmem>>, %arg4: memref<16x16xf32, #tpu.memory_space<vmem>>, %arg5: memref<16x1xf32, #tpu.memory_space<vmem>>, %arg6: memref<1x16xf32, #tpu.memory_space<vmem>>, %arg7: memref<1x1xf32, #tpu.memory_space<vmem>>, %arg8: memref<1x128xf32, #tpu.memory_space<vmem>>) attributes {dimension_semantics = [#tpu.dimension_semantics<parallel>], iteration_bounds = array<i64: 1>, scalar_prefetch = 0 : i64, scratch_operands = 0 : i64, tpu.core_type = #tpu.core_type<tc>, window_params = [{transform_indices = @transform_0, window_bounds = array<i64: 128, 30>}, {pipeline_mode = #tpu.pipeline_mode<synchronous>, transform_indices = @transform_1, window_bounds = array<i64: 16, 30>}, {pipeline_mode = #tpu.pipeline_mode<synchronous>, transform_indices = @transform_2, window_bounds = array<i64: 16, 1>}, {pipeline_mode = #tpu.pipeline_mode<synchronous>, transform_indices = @transform_3, window_bounds = array<i64: 16, 16>}, {pipeline_mode = #tpu.pipeline_mode<synchronous>, transform_indices = @transform_4, window_bounds = array<i64: 16, 1>}, {pipeline_mode = #tpu.pipeline_mode<synchronous>, transform_indices = @transform_5, window_bounds = array<i64: 1, 16>}, {pipeline_mode = #tpu.pipeline_mode<synchronous>, transform_indices = @transform_6, window_bounds = array<i64: 1, 1>}, {transform_indices = @transform_7, window_bounds = array<i64: 1, 128>}]} {
    %c0 = arith.constant 0 : index
    %c0_0 = arith.constant 0 : index
    %0 = vector.load %arg2[%c0, %c0_0] : memref<16x30xf32, #tpu.memory_space<vmem>>, vector<16x30xf32>
    %c0_1 = arith.constant 0 : index
    %c0_2 = arith.constant 0 : index
    %1 = vector.load %arg1[%c0_1, %c0_2] : memref<128x30xf32, #tpu.memory_space<vmem>>, vector<128x30xf32>
    %cst = arith.constant dense<0.000000e+00> : vector<16x128xf32>
    %2 = tpu.matmul %0, %1, %cst {dimension_numbers = #tpu.dot_dimension_numbers<[1], [1], [0], [0], [0, 0, 1, 0], [], []>} : vector<16x30xf32>, vector<128x30xf32>, vector<16x128xf32> -> vector<16x128xf32>
    %c0_3 = arith.constant 0 : index
    %c0_4 = arith.constant 0 : index
    %3 = vector.load %arg3[%c0_3, %c0_4] : memref<16x1xf32, #tpu.memory_space<vmem>>, vector<16x1xf32>
    %4 = vector.broadcast %3 : vector<16x1xf32> to vector<16x128xf32>
    %5 = arith.addf %2, %4 : vector<16x128xf32>
    %cst_5 = arith.constant 0.000000e+00 : f32
    %6 = vector.broadcast %cst_5 : f32 to vector<16x128xf32>
    %7 = arith.maximumf %5, %6 : vector<16x128xf32>
    %c0_6 = arith.constant 0 : index
    %c0_7 = arith.constant 0 : index
    %8 = vector.load %arg4[%c0_6, %c0_7] : memref<16x16xf32, #tpu.memory_space<vmem>>, vector<16x16xf32>
    %cst_8 = arith.constant dense<0.000000e+00> : vector<16x128xf32>
    %9 = tpu.matmul %8, %7, %cst_8 {dimension_numbers = #tpu.dot_dimension_numbers<[1], [0], [0], [1], [0, 0, 1, 1], [], []>} : vector<16x16xf32>, vector<16x128xf32>, vector<16x128xf32> -> vector<16x128xf32>
    %c0_9 = arith.constant 0 : index
    %c0_10 = arith.constant 0 : index
    %10 = vector.load %arg5[%c0_9, %c0_10] : memref<16x1xf32, #tpu.memory_space<vmem>>, vector<16x1xf32>
    %11 = vector.broadcast %10 : vector<16x1xf32> to vector<16x128xf32>
    %12 = arith.addf %9, %11 : vector<16x128xf32>
    %cst_11 = arith.constant 0.000000e+00 : f32
    %13 = vector.broadcast %cst_11 : f32 to vector<16x128xf32>
    %14 = arith.maximumf %12, %13 : vector<16x128xf32>
    %c0_12 = arith.constant 0 : index
    %c0_13 = arith.constant 0 : index
    %15 = vector.load %arg6[%c0_12, %c0_13] : memref<1x16xf32, #tpu.memory_space<vmem>>, vector<1x16xf32>
    %cst_14 = arith.constant dense<0.000000e+00> : vector<1x128xf32>
    %16 = tpu.matmul %15, %14, %cst_14 {dimension_numbers = #tpu.dot_dimension_numbers<[1], [0], [0], [1], [0, 0, 1, 1], [], []>} : vector<1x16xf32>, vector<16x128xf32>, vector<1x128xf32> -> vector<1x128xf32>
    %c0_15 = arith.constant 0 : index
    %c0_16 = arith.constant 0 : index
    %17 = vector.load %arg7[%c0_15, %c0_16] : memref<1x1xf32, #tpu.memory_space<vmem>>, vector<1x1xf32>
    %18 = vector.broadcast %17 : vector<1x1xf32> to vector<1x128xf32>
    %19 = arith.addf %16, %18 : vector<1x128xf32>
    %cst_17 = arith.constant 5.000000e-01 : f32
    %20 = vector.broadcast %cst_17 : f32 to vector<1x128xf32>
    %21 = arith.mulf %20, %19 : vector<1x128xf32>
    %22 = math.tanh %21 : vector<1x128xf32>
    %cst_18 = arith.constant 1.000000e+00 : f32
    %23 = vector.broadcast %cst_18 : f32 to vector<1x128xf32>
    %24 = arith.addf %22, %23 : vector<1x128xf32>
    %cst_19 = arith.constant 5.000000e-01 : f32
    %25 = vector.broadcast %cst_19 : f32 to vector<1x128xf32>
    %26 = arith.mulf %25, %24 : vector<1x128xf32>
    %c0_20 = arith.constant 0 : index
    %c0_21 = arith.constant 0 : index
    %27 = vector.load %arg8[%c0_20, %c0_21] : memref<1x128xf32, #tpu.memory_space<vmem>>, vector<1x128xf32>
    tpu.vector_store %arg8[%c0_20, %c0_21], %26 {strides = array<i32>} : memref<1x128xf32, #tpu.memory_space<vmem>>, vector<1x128xf32>,
    return
  }
  func.func @transform_0(%arg0: i32) -> (i32, i32) {
    %c0_i32 = arith.constant 0 : i32
    %c0_i32_0 = arith.constant 0 : i32
    return %arg0, %c0_i32 : i32, i32
  }
  func.func @transform_1(%arg0: i32) -> (i32, i32) {
    %c0_i32 = arith.constant 0 : i32
    %c0_i32_0 = arith.constant 0 : i32
    %c0_i32_1 = arith.constant 0 : i32
    return %c0_i32, %c0_i32_0 : i32, i32
  }
  func.func @transform_2(%arg0: i32) -> (i32, i32) {
    %c0_i32 = arith.constant 0 : i32
    %c0_i32_0 = arith.constant 0 : i32
    %c0_i32_1 = arith.constant 0 : i32
    return %c0_i32, %c0_i32_0 : i32, i32
  }
  func.func @transform_3(%arg0: i32) -> (i32, i32) {
    %c0_i32 = arith.constant 0 : i32
    %c0_i32_0 = arith.constant 0 : i32
    %c0_i32_1 = arith.constant 0 : i32
    return %c0_i32, %c0_i32_0 : i32, i32
  }
  func.func @transform_4(%arg0: i32) -> (i32, i32) {
    %c0_i32 = arith.constant 0 : i32
    %c0_i32_0 = arith.constant 0 : i32
    %c0_i32_1 = arith.constant 0 : i32
    return %c0_i32, %c0_i32_0 : i32, i32
  }
  func.func @transform_5(%arg0: i32) -> (i32, i32) {
    %c0_i32 = arith.constant 0 : i32
    %c0_i32_0 = arith.constant 0 : i32
    %c0_i32_1 = arith.constant 0 : i32
    return %c0_i32, %c0_i32_0 : i32, i32
  }
  func.func @transform_6(%arg0: i32) -> (i32, i32) {
    %c0_i32 = arith.constant 0 : i32
    %c0_i32_0 = arith.constant 0 : i32
    %c0_i32_1 = arith.constant 0 : i32
    return %c0_i32, %c0_i32_0 : i32, i32
  }
  func.func @transform_7(%arg0: i32) -> (i32, i32) {
    %c0_i32 = arith.constant 0 : i32
    %c0_i32_0 = arith.constant 0 : i32
    return %c0_i32, %arg0 : i32, i32
  }
}

</mosaic_0001>

<bundles_post_ra>
// kernel: tpu_custom_call.1
= control target key start
LH: loop header
LB: loop body
LE: loop exit
PB: predicated region body
PF: predicated region fallthrough
CT: control target
= control target key end

     0   :  { %s677_s0 = inlined_call_operand.hbm [shape: f32[8,30], index: 0, kind: input, shape index: {}]   ;;  %s678_s1 = inlined_call_operand.vmem [shape: f32[16,30], index: 1, kind: input, shape index: {}]   ;;  %s679_s2 = inlined_call_operand.vmem [shape: f32[16,1], index: 2, kind: input, shape index: {}]   ;;  %s680_s3 = inlined_call_operand.vmem [shape: f32[16,16], index: 3, kind: input, shape index: {}]   ;;  %s681_s4 = inlined_call_operand.vmem [shape: f32[16,1], index: 4, kind: input, shape index: {}]   ;;  %s682_s5 = inlined_call_operand.vmem [shape: f32[1,16], index: 5, kind: input, shape index: {}]   ;;  %s683_s6 = inlined_call_operand.<no memory space> [shape: f32[1,1], index: 6, kind: input, shape index: {}]   ;;  %s684_s7 = inlined_call_operand.hbm [shape: f32[1,8], index: 7, kind: output, shape index: {}]  }
   0x1   :  { %v12_v0 = vstv %s683_s6 }
   0x2   :  { %13 = vst [vmem:[#allocation2] sm:$0x1] %v12_v0 }
   0x3   :  { %14 = vsyncpa [#allocation4], 0 }
   0x4   :  { %15 = vsyncpa [#allocation5], 0 }
   0x5   :  { %20 = vsyncadd [#allocation4], 1920  ;;  %s557_s26 = smov [#allocation3]  }
   0x6   :  { %s21_s27 = sshll.u32 %s557_s26, 4  ;;  %s22_s27 = int_to_ptr.vmem [resolvable:$true] %s21_s27 }
   0x7   :  { %s521_s28 = scalar_lea.vmem %s22_s27, 128  ;;  %s525_s29 = scalar_lea.vmem %s22_s27, 2048 }
   0x8   :  { %p522_p0 = scmp.ne.s32.totalorder %s22_s27, %s521_s28  ;;  %p526_p1 = scmp.lt.s32.totalorder %s22_s27, %s22_s27 }
   0x9   :  { %p527_p2 = scmp.lt.s32.totalorder %s525_s29, %s521_s28 }
   0xb   :  { %p528_p3 = por %p527_p2, %p526_p1 }
   0xd   :  { %p529_p4 = pnand %p528_p3, %p522_p0 }
   0xf   :  { %532 = shalt.err (!%p529_p4)
}
  0x10   :  { %s558_s30 = smov 128   ;;  %s559_s8 = smov 8  }
  0x11   :  { %27 = dma.hbm_to_vmem [thread:$0]  %s677_s0, 128, %s22_s27, [#allocation4], %s558_s30, %s558_s30, %s559_s8  }
  0x12   :  { %553 = dma.done.wait [#allocation4], 2048  }
  0x13   :  { %554 = vsyncadd [#allocation4], 4294965248  ;;  %v560_v1 = vmov 0   ;;  %vm73_vm0 = vcmask 244736   ;;  %v60_v2 = vld [vmem:[#allocation3 + $0x78] sm:$0xff]  ;;  %v59_v3 = vld [vmem:[#allocation3 + $0x70] sm:$0xff]  ;;  %v310_v45 = vlaneseq }
  0x14   :  { %509 = vset.pattern.permute.xlu0 %v560_v1  ;;  %510 = vset.pattern.permute.xlu1 %v560_v1  ;;  %v58_v4 = vld [vmem:[#allocation3 + $0x68] sm:$0xff]  ;;  %v43_v5 = vld [vmem:[%s678_s1] sm:$0xff]  ;;  %v55_v11 = vld [vmem:[#allocation3 + $0x50] sm:$0xff]  ;;  %vm219_vm1 = vcmask 130048   ;;  %v561_v35 = vmov 0.0   ;;  %vm562_vm2 = vmmov 0  }
  0x15   :  { %453 = vmatprep.subr.msk.mxu0 %vm73_vm0, %v60_v2  ;;  %485 = vmatprep.mubr.msk.f32.mxu0 %vm73_vm0, %v43_v5  ;;  %v62_v6 = vld [vmem:[%s679_s2 + $0x8] sm:$0xff]  ;;  %v61_v8 = vld [vmem:[%s679_s2] sm:$0xff]  ;;  %v51_v15 = vld [vmem:[#allocation3 + $0x30] sm:$0xff]  ;;  %v311_v46 = vshrl.u32 %v310_v45, 7 }
  0x16   :  { %454 = vmatpush3.xpose.msk.msra.mxu0 %vm73_vm0, %v60_v2  ;;  %70 = vperm.xlu0 %509, %v62_v6   ;;  %v57_v7 = vld [vmem:[#allocation3 + $0x60] sm:$0xff]  ;;  %v56_v9 = vld [vmem:[#allocation3 + $0x58] sm:$0xff]  ;;  %v54_v12 = vld [vmem:[#allocation3 + $0x48] sm:$0xff] }
  0x17   :  { %455 = vmatprep.subr.msk.mxu0 %vm73_vm0, %v59_v3  ;;  %v304_v10 = vld [vmem:[#allocation2] sm:$0x1]  ;;  %v53_v13 = vld [vmem:[#allocation3 + $0x40] sm:$0xff]  ;;  %v50_v16 = vld [vmem:[#allocation3 + $0x28] sm:$0xff]  ;;  %v312_v47 = vsub.s32 0, %v311_v46 }
  0x18   :  { %v52_v14 = vld [vmem:[#allocation3 + $0x38] sm:$0xff]  ;;  %v49_v17 = vld [vmem:[#allocation3 + $0x20] sm:$0xff]  ;;  %v47_v19 = vld [vmem:[#allocation3 + $0x10] sm:$0xff] }
  0x19   :  { %v48_v18 = vld [vmem:[#allocation3 + $0x18] sm:$0xff]  ;;  %v46_v20 = vld [vmem:[#allocation3 + $0x8] sm:$0xff]  ;;  %v45_v21 = vld [vmem:[#allocation3] sm:$0xff] }
  0x1a   :  { %456 = vmatpush3.xpose.msk.msra.mxu0 %vm73_vm0, %v59_v3  ;;  %65 = vperm.xlu0 %509, %v61_v8   ;;  %v44_v22 = vld [vmem:[%s678_s1 + $0x8] sm:$0xff]  ;;  %v205_v23 = vld [vmem:[%s680_s3] sm:$0xff] }
  0x1b   :  { %457 = vmatprep.subr.msk.mxu0 %vm73_vm0, %v58_v4  ;;  %492 = vmatprep.mubr.msk.f32.mxu1 %vm219_vm1, %v205_v23  ;;  %v208_v24 = vld [vmem:[%s681_s4 + $0x8] sm:$0xff]  ;;  %v207_v25 = vld [vmem:[%s681_s4] sm:$0xff] }
  0x1c   :  { %216 = vperm.xlu1 %510, %v208_v24   ;;  %v206_v34 = vld [vmem:[%s680_s3 + $0x8] sm:$0xff]  ;;  %v303_v44 = vld [vmem:[%s682_s5] sm:$0x1]  ;;  %s563_s3 = smov [#allocation6]  }
  0x1d   :  { %s398_s24 = sshll.u32 %s563_s3, 4  ;;  %s399_s24 = int_to_ptr.vmem [resolvable:$true] %s398_s24 }
  0x1e   :  { %458 = vmatpush3.xpose.msk.msra.mxu0 %vm73_vm0, %v58_v4  ;;  %307 = vperm.xlu0 %509, %v304_v10   ;;  %s533_s5 = scalar_lea.vmem %s399_s24, 16  ;;  %s537_s25 = scalar_lea.vmem %s399_s24, 32 }
  0x1f   :  { %459 = vmatprep.subr.msk.mxu0 %vm73_vm0, %v57_v7  ;;  %p534_p5 = scmp.ne.s32.totalorder %s399_s24, %s533_s5  ;;  %p538_p6 = scmp.lt.s32.totalorder %s399_s24, %s399_s24 }
  0x20   :  { %211 = vperm.xlu1 %510, %v207_v25   ;;  %p539_p7 = scmp.lt.s32.totalorder %s537_s25, %s533_s5 }
  0x22   :  { %460 = vmatpush3.xpose.msk.msra.mxu0 %vm73_vm0, %v57_v7  ;;  %p540_p8 = por %p539_p7, %p538_p6 }
  0x23   :  { %461 = vmatprep.subr.msk.mxu0 %vm73_vm0, %v56_v9 }
  0x24   :  { %p541_p9 = pnand %p540_p8, %p534_p5 }
  0x26   :  { %462 = vmatpush3.xpose.msk.msra.mxu0 %vm73_vm0, %v56_v9 }
  0x27   :  { %463 = vmatprep.subr.msk.mxu0 %vm73_vm0, %v55_v11 }
  0x2a   :  { %464 = vmatpush3.xpose.msk.msra.mxu0 %vm73_vm0, %v55_v11 }
  0x2b   :  { %465 = vmatprep.subr.msk.mxu0 %vm73_vm0, %v54_v12 }
  0x2e   :  { %466 = vmatpush3.xpose.msk.msra.mxu0 %vm73_vm0, %v54_v12 }
  0x2f   :  { %467 = vmatprep.subr.msk.mxu0 %vm73_vm0, %v53_v13 }
  0x32   :  { %468 = vmatpush3.xpose.msk.msra.mxu0 %vm73_vm0, %v53_v13 }
  0x33   :  { %469 = vmatprep.subr.msk.mxu0 %vm73_vm0, %v52_v14 }
  0x36   :  { %470 = vmatpush3.xpose.msk.msra.mxu0 %vm73_vm0, %v52_v14 }
  0x37   :  { %471 = vmatprep.subr.msk.mxu0 %vm73_vm0, %v51_v15 }
  0x3a   :  { %472 = vmatpush3.xpose.msk.msra.mxu0 %vm73_vm0, %v51_v15 }
  0x3b   :  { %473 = vmatprep.subr.msk.mxu0 %vm73_vm0, %v50_v16 }
  0x3e   :  { %474 = vmatpush3.xpose.msk.msra.mxu0 %vm73_vm0, %v50_v16 }
  0x3f   :  { %475 = vmatprep.subr.msk.mxu0 %vm73_vm0, %v49_v17 }
  0x42   :  { %476 = vmatpush3.xpose.msk.msra.mxu0 %vm73_vm0, %v49_v17 }
  0x43   :  { %477 = vmatprep.subr.msk.mxu0 %vm73_vm0, %v48_v18 }
  0x46   :  { %478 = vmatpush3.xpose.msk.msra.mxu0 %vm73_vm0, %v48_v18 }
  0x47   :  { %479 = vmatprep.subr.msk.mxu0 %vm73_vm0, %v47_v19 }
  0x4a   :  { %480 = vmatpush3.xpose.msk.msra.mxu0 %vm73_vm0, %v47_v19 }
  0x4b   :  { %481 = vmatprep.subr.msk.mxu0 %vm73_vm0, %v46_v20 }
  0x4e   :  { %482 = vmatpush3.xpose.msk.msra.mxu0 %vm73_vm0, %v46_v20 }
  0x4f   :  { %483 = vmatprep.subr.msk.mxu0 %vm73_vm0, %v45_v21 }
  0x52   :  { %484 = vmatpush3.xpose.msk.msra.mxu0 %vm73_vm0, %v45_v21 }
  0x55   :  { %486 = vmatmul.mubr.msk.f32.vlgmr.msra.gmra.mxu0 %vm73_vm0, %v44_v22 }
  0x91   :  { %v71_v26 = vpop.permute.xlu0 %70 }
  0x95   :  { %v66_v29 = vpop.permute.xlu0 %65 }
  0x97   :  { %v217_v36 = vpop.permute.xlu1 %216 }
  0x99   :  { %v308_v48 = vpop.permute.xlu0 %307 }
  0x9a   :  { %v313_v49 = vrot.slane %v308_v48, %v312_v47 }
  0x9b   :  { %v212_v39 = vpop.permute.xlu1 %211 }
 0x115   :  { %v487_v27 = vpop.f32.mrf.mxu0 }
 0x116   :  { %v200_v28 = vadd.f32 %v487_v27, %v71_v26 }
 0x117   :  { %v194_v30 = vpop.f32.mrf.mxu0 }
 0x118   :  { %v204_v31 = vmax.f32 %v200_v28, 0.0  ;;  %v195_v32 = vadd.f32 %v194_v30, %v66_v29 }
 0x11a   :  { %v203_v33 = vmax.f32 %v195_v32, 0.0  ;;  %488 = vmatprep.subr.mxu1 %v204_v31 }
 0x11b   :  { %489 = vmatpush3.msra.mxu1 %v204_v31 }
 0x11c   :  { %490 = vmatprep.subr.mxu1 %v203_v33 }
 0x11d   :  { %491 = vmatpush3.msra.mxu1 %v203_v33 }
 0x11e   :  { %493 = vmatmul.mubr.msk.f32.vlgmr.msra.gmra.mxu1 %vm219_vm1, %v206_v34  ;;  %495 = vmatprep.subr.mxu1 %v561_v35 }
 0x11f   :  { %499 = vmatprep.mubr.msk.f32.mxu1 %vm562_vm2, %v561_v35 }
 0x1de   :  { %v494_v37 = vpop.f32.mrf.mxu1 }
 0x1df   :  { %v298_v38 = vadd.f32 %v494_v37, %v217_v36 }
 0x1e0   :  { %v292_v40 = vpop.f32.mrf.mxu1 }
 0x1e1   :  { %v302_v41 = vmax.f32 %v298_v38, 0.0  ;;  %v293_v42 = vadd.f32 %v292_v40, %v212_v39 }
 0x1e3   :  { %v301_v43 = vmax.f32 %v293_v42, 0.0  ;;  %496 = vmatpush3.msra.mxu1 %v302_v41 }
 0x1e4   :  { %497 = vmatprep.subr.mxu1 %v561_v35 }
 0x1e5   :  { %498 = vmatpush3.msra.mxu1 %v301_v43 }
 0x1e6   :  { %500 = vmatmul.mubr.msk.f32.vlgmr.msra.gmra.mxu1 %vm219_vm1, %v303_v44 }
 0x2a6   :  { %v383_v50 = vpop.f32.mrf.mxu1 }
 0x2a7   :  { %v384_v51 = vadd.f32 %v383_v50, %v313_v49 }
 0x2a8   :  { %v501_v52 = vpop.f32.mrf.mxu1 }
 0x2a9   :  { %v387_v53 = vmul.f32 0.5, %v384_v51 }
 0x2ab   :  { %511 = vtanh.f32 %v387_v53 }
 0x2b8   :  { %v512_v54 = vpop.eup %511 }
 0x2b9   :  { %v389_v55 = vadd.f32 1.0, %v512_v54 }
 0x2bb   :  { %v390_v56 = vmul.f32 0.5, %v389_v55 }
 0x2bd   :  { %391 = vst [vmem:[#allocation6] sm:$0x1] %v390_v56 }
 0x2be   :  { %544 = shalt.err (!%p541_p9)
}
 0x2bf   :  { %401 = dma.vmem_to_hbm [thread:$0]  %s399_s24, 16, %s684_s7, [#allocation5]  }
 0x2c0   :  { %555 = dma.done.wait [#allocation5], 16  }
 0x2c1   :  { %556 = vsyncadd [#allocation5], 4294967280 }
 0x2c2   :  { %405 = vsyncpa [#allocation4], 1 }
 0x2c3   :  { %406 = vsyncpa [#allocation5], 1 }

</bundles_post_ra>
